<compile_context>
chip_gen: v7x
topology: tpu7x:2x2x1
jax: 0.10.0
libtpu: 0.0.40
codegen_flags: <defaults>
</compile_context>

<pallas_src>
import jax
import jax.numpy as jnp
from jax.experimental import pallas as pl
from jax.experimental.pallas import tpu as pltpu


def _linreg_kernel(w_ref, b_ref, x_ref, o_ref):
    # w_ref, b_ref: shape-(1,) f32 scalars in SMEM; x_ref/o_ref: VMEM tiles.
    o_ref[...] = w_ref[0] * x_ref[...] + b_ref[0]


def _pick_tile_rows(n_rows, row_bytes, target_block_bytes):
    """Largest multiple-of-8 row count giving a ~target_block_bytes block."""
    rows = max(8, (target_block_bytes // max(row_bytes, 1)) // 8 * 8)
    if n_rows <= rows:
        # Whole array in one block; a block equal to the full dim is always legal.
        return n_rows
    return rows


def linear_regression_forward(x, weights, bias, *, target_block_bytes=4 << 20):
    """y = weights * x + bias  (weights, bias are shape-(1,) f32 params).

    Accepts any-rank x; internally flattened to 2D [rows, last_dim] so the last
    dim stays lane-dense and rows are tiled into ~4 MiB blocks.
    """
    orig_shape = x.shape
    if x.ndim != 2:
        x = x.reshape(-1, orig_shape[-1]) if x.ndim >= 1 else x.reshape(1, 1)

    N, D = x.shape
    row_bytes = D * x.dtype.itemsize
    tile_rows = _pick_tile_rows(N, row_bytes, target_block_bytes)
    grid = (pl.cdiv(N, tile_rows),)

    y = pl.pallas_call(
        _linreg_kernel,
        out_shape=jax.ShapeDtypeStruct((N, D), x.dtype),
        grid_spec=pltpu.PrefetchScalarGridSpec(
            num_scalar_prefetch=0,
            grid=grid,
            in_specs=[
                pl.BlockSpec(memory_space=pltpu.SMEM),          # weights (1,)
                pl.BlockSpec(memory_space=pltpu.SMEM),          # bias    (1,)
                pl.BlockSpec((tile_rows, D), lambda i: (i, 0)),  # x tile
            ],
            out_specs=pl.BlockSpec((tile_rows, D), lambda i: (i, 0)),
        ),
        compiler_params=pltpu.CompilerParams(
            dimension_semantics=("parallel",),   # lets v7x shard blocks over 2 TCs
            vmem_limit_bytes=48 << 20,           # > default scoped limit, < v7x 64 MiB
        ),
    )(weights, bias, x)

    return y.reshape(orig_shape)


if __name__ == "__main__":
    key = jax.random.PRNGKey(0)
    kx, kw, kb, kx2 = jax.random.split(key, 4)

    # Deterministic "randn"-style parameter init (same shapes as nn.Parameter).
    weights = jax.random.normal(kw, (1,), dtype=jnp.float32)
    bias = jax.random.normal(kb, (1,), dtype=jnp.float32)

    # Small input consistent with an elementwise scalar-affine forward.
    x = jax.random.normal(kx, (16, 128), dtype=jnp.float32)
    y = jax.block_until_ready(linear_regression_forward(x, weights, bias))
    y_ref = weights * x + bias
    assert y.shape == x.shape and y.dtype == x.dtype
    assert jnp.allclose(y, y_ref, atol=1e-6, rtol=1e-6)

    # Odd (non-128-lane, non-2D) shape to check generality of the wrapper.
    x2 = jax.random.normal(kx2, (3, 37, 96), dtype=jnp.float32)
    y2 = jax.block_until_ready(linear_regression_forward(x2, weights, bias))
    y2_ref = weights * x2 + bias
    assert y2.shape == x2.shape
    assert jnp.allclose(y2, y2_ref, atol=1e-6, rtol=1e-6)

    print("KERNEL_OK")
</pallas_src>

<mosaic_0001>
module attributes {stable_mosaic.version = 11 : i64} {
  func.func @_linreg_kernel(%arg0: i32, %arg1: memref<1xf32, #tpu.memory_space<smem>>, %arg2: memref<1xf32, #tpu.memory_space<smem>>, %arg3: memref<16x128xf32, #tpu.memory_space<vmem>>, %arg4: memref<16x128xf32, #tpu.memory_space<vmem>>) attributes {dimension_semantics = [#tpu.dimension_semantics<parallel>], iteration_bounds = array<i64: 1>, scalar_prefetch = 0 : i64, scratch_operands = 0 : i64, tpu.core_type = #tpu.core_type<tc>, window_params = [{transform_indices = @transform_0, window_bounds = array<i64: 1>}, {transform_indices = @transform_1, window_bounds = array<i64: 1>}, {transform_indices = @transform_2, window_bounds = array<i64: 16, 128>}, {transform_indices = @transform_3, window_bounds = array<i64: 16, 128>}]} {
    %c0 = arith.constant 0 : index
    %0 = memref.load %arg1[%c0] : memref<1xf32, #tpu.memory_space<smem>>
    %c0_0 = arith.constant 0 : index
    %c0_1 = arith.constant 0 : index
    %1 = vector.load %arg3[%c0_0, %c0_1] : memref<16x128xf32, #tpu.memory_space<vmem>>, vector<16x128xf32>
    %2 = vector.broadcast %0 : f32 to vector<16x128xf32>
    %3 = arith.mulf %2, %1 : vector<16x128xf32>
    %c0_2 = arith.constant 0 : index
    %4 = memref.load %arg2[%c0_2] : memref<1xf32, #tpu.memory_space<smem>>
    %5 = vector.broadcast %4 : f32 to vector<16x128xf32>
    %6 = arith.addf %3, %5 : vector<16x128xf32>
    %c0_3 = arith.constant 0 : index
    %c0_4 = arith.constant 0 : index
    %7 = vector.load %arg4[%c0_3, %c0_4] : memref<16x128xf32, #tpu.memory_space<vmem>>, vector<16x128xf32>
    tpu.vector_store %arg4[%c0_3, %c0_4], %6 {strides = array<i32>} : memref<16x128xf32, #tpu.memory_space<vmem>>, vector<16x128xf32>,
    return
  }
  func.func @transform_0(%arg0: i32) -> i32 {
    %c0_i32 = arith.constant 0 : i32
    %c0_i32_0 = arith.constant 0 : i32
    return %c0_i32 : i32
  }
  func.func @transform_1(%arg0: i32) -> i32 {
    %c0_i32 = arith.constant 0 : i32
    %c0_i32_0 = arith.constant 0 : i32
    return %c0_i32 : i32
  }
  func.func @transform_2(%arg0: i32) -> (i32, i32) {
    %c0_i32 = arith.constant 0 : i32
    %c0_i32_0 = arith.constant 0 : i32
    return %arg0, %c0_i32 : i32, i32
  }
  func.func @transform_3(%arg0: i32) -> (i32, i32) {
    %c0_i32 = arith.constant 0 : i32
    %c0_i32_0 = arith.constant 0 : i32
    return %arg0, %c0_i32 : i32, i32
  }
}

</mosaic_0001>

<bundles_post_ra>
// kernel: tpu_custom_call.1
= control target key start
LH: loop header
LB: loop body
LE: loop exit
PB: predicated region body
PF: predicated region fallthrough
CT: control target
= control target key end

     0   :  { %10 = vsyncpa [#allocation5], 0  ;;  %s172_s0 = inlined_call_operand.<no memory space> [shape: f32[1], index: 0, kind: input, shape index: {}]   ;;  %s173_s1 = inlined_call_operand.<no memory space> [shape: f32[1], index: 1, kind: input, shape index: {}]   ;;  %s174_s2 = inlined_call_operand.hbm [shape: f32[16,128], index: 2, kind: input, shape index: {}]   ;;  %s175_s3 = inlined_call_operand.hbm [shape: f32[16,128], index: 3, kind: output, shape index: {}]  }
   0x1   :  { %11 = vsyncpa [#allocation6], 0  ;;  %s112_s12 = smov [#allocation4]   ;;  %s64_s16 = scalar_lea.hbm %s174_s2, 256 }
   0x2   :  { %s21_s13 = sshll.u32 %s112_s12, 4  ;;  %p65_p0 = scmp.ne.s32.totalorder %s174_s2, %s64_s16  ;;  %s22_s13 = int_to_ptr.vmem [resolvable:$true] %s21_s13 }
   0x3   :  { %p68_p1 = scmp.lt.u32.totalorder %s64_s16, %s174_s2 }
   0x5   :  { %p70_p2 = pnand %p68_p1, %p65_p0 }
   0x7   :  { %73 = shalt.err (!%p70_p2)
}
   0x8   :  { %s74_s21 = scalar_lea.vmem %s22_s13, 256  ;;  %p79_p4 = scmp.lt.s32.totalorder %s22_s13, %s22_s13 }
   0x9   :  { %p75_p3 = scmp.ne.s32.totalorder %s22_s13, %s74_s21  ;;  %p80_p5 = scmp.lt.s32.totalorder %s74_s21, %s74_s21 }
   0xb   :  { %p81_p6 = por %p80_p5, %p79_p4 }
   0xd   :  { %p82_p7 = pnand %p81_p6, %p75_p3 }
   0xf   :  { %85 = shalt.err (!%p82_p7)
}
  0x10   :  { %s113_s22 = smov 128   ;;  %s114_s23 = smov 8  }
  0x11   :  { %27 = dma.hbm_to_vmem [thread:$0]  %s174_s2, 256, %s22_s13, [#allocation5], %s113_s22, %s113_s22, %s114_s23  }
  0x12   :  { %108 = dma.done.wait [#allocation5], 256  }
  0x13   :  { %109 = vsyncadd [#allocation5], 4294967040  ;;  %v34_v0 = vstv %s172_s0  ;;  %v32_v1 = vld [vmem:[#allocation4] sm:$0xff]  ;;  %v38_v2 = vstv %s173_s1  ;;  %v33_v3 = vld [vmem:[#allocation4 + $0x8] sm:$0xff]  ;;  %s115_s30 = smov [#allocation7]  }
  0x14   :  { %s48_s4 = sshll.u32 %s115_s30, 4  ;;  %v35_v4 = vmul.f32 %v34_v0, %v32_v1  ;;  %v36_v5 = vmul.f32 %v34_v0, %v33_v3  ;;  %s49_s4 = int_to_ptr.vmem [resolvable:$true] %s48_s4 }
  0x15   :  { %s86_s2 = scalar_lea.vmem %s49_s4, 256  ;;  %p91_p9 = scmp.lt.s32.totalorder %s49_s4, %s49_s4 }
  0x16   :  { %v39_v6 = vadd.f32 %v38_v2, %v35_v4  ;;  %v40_v7 = vadd.f32 %v38_v2, %v36_v5  ;;  %p87_p8 = scmp.ne.s32.totalorder %s49_s4, %s86_s2  ;;  %p92_p10 = scmp.lt.s32.totalorder %s86_s2, %s86_s2 }
  0x18   :  { %41 = vst [vmem:[#allocation7] sm:$0xff] %v39_v6  ;;  %42 = vst [vmem:[#allocation7 + $0x8] sm:$0xff] %v40_v7  ;;  %p93_p11 = por %p92_p10, %p91_p9 }
  0x1a   :  { %p94_p12 = pnand %p93_p11, %p87_p8 }
  0x1c   :  { %97 = shalt.err (!%p94_p12)
}
  0x1d   :  { %s98_s1 = scalar_lea.hbm %s175_s3, 256 }
  0x1e   :  { %p99_p13 = scmp.ne.s32.totalorder %s175_s3, %s98_s1  ;;  %p102_p0 = scmp.lt.u32.totalorder %s98_s1, %s175_s3 }
  0x20   :  { %p104_p1 = pnand %p102_p0, %p99_p13 }
  0x22   :  { %107 = shalt.err (!%p104_p1)
}
  0x23   :  { %54 = dma.vmem_to_hbm [thread:$0]  %s49_s4, 256, %s175_s3, [#allocation6], %s113_s22, %s113_s22, %s114_s23  }
  0x24   :  { %110 = dma.done.wait [#allocation6], 256  }
  0x25   :  { %111 = vsyncadd [#allocation6], 4294967040 }
  0x26   :  { %58 = vsyncpa [#allocation5], 1 }
  0x27   :  { %59 = vsyncpa [#allocation6], 1 }

</bundles_post_ra>
